<compile_context>
chip_gen: v5e
topology: v5e:2x2
jax: 0.10.0
libtpu: 0.0.40
codegen_flags: <defaults>
</compile_context>

<pallas_src>
import functools

import jax
import jax.numpy as jnp
import numpy as np
from jax import lax
from jax.experimental import pallas as pl
from jax.experimental.pallas import tpu as pltpu


def _round_up(v, m):
    return ((v + m - 1) // m) * m


def _convdeepset_kernel(gamma_ref, x_ref, y_ref, t_ref, w_ref, b_ref,
                        out_ref, acc_ref, *, n_ch, c_pad, use_density, exp_bf16):
    """One (batch b, target-tile j, context-chunk k) grid step.

    gamma_ref : SMEM (n_ch,)      per-channel -0.5/scale^2
    x_ref     : (1, NC, 1)        context-location chunk (column, contexts on sublanes)
    y_ref     : (1, n_ch, NC)     [density-ones ; y^T] chunk (contexts lane-dense)
    t_ref     : (1, 1, TM)        target-location tile (row, targets on lanes)
    w_ref     : (c_pad, Cout)     Linear weight, transposed + zero-padded K
    b_ref     : (1, Cout)         Linear bias row
    out_ref   : (1, TM, Cout)     output tile (written only at the last context chunk)
    acc_ref   : VMEM (n_ch, TM)   running per-channel weighted sums over context
    """
    k = pl.program_id(2)

    @pl.when(k == 0)
    def _init():
        acc_ref[...] = jnp.zeros_like(acc_ref)

    xs = x_ref[0]                       # (NC, 1)
    ts = t_ref[0]                       # (1, TM)
    d = (xs - ts) ** 2                  # (NC, TM) pairwise squared distances
    y = y_ref[0]                        # (n_ch, NC)

    contribs = []
    for c in range(n_ch):               # n_ch is tiny (in_channels+1) -> unrolled
        scaled = d * gamma_ref[c]       # gamma <= 0, so exp in (0, 1]; no overflow risk
        if exp_bf16:
            # v6e/v7x only: bf16 EUP exp at ~2x throughput (keep accumulation in f32).
            wt = jnp.exp(scaled.astype(jnp.bfloat16))
            yc = y[c:c + 1, :].astype(jnp.bfloat16)
        else:
            wt = jnp.exp(scaled)
            yc = y[c:c + 1, :]
        # Weighted reduce over the context chunk on the (otherwise idle) MXU.
        contribs.append(jnp.dot(yc, wt, preferred_element_type=jnp.float32))  # (1, TM)
    acc_ref[...] += jnp.concatenate(contribs, axis=0)           # (n_ch, TM)

    @pl.when(k == pl.num_programs(2) - 1)
    def _finalize():
        acc = acc_ref[...]                                      # (n_ch, TM)
        if use_density:
            dens = acc[0:1, :]
            inv = 1.0 / (dens + 1e-8)
            feat = jnp.concatenate([dens, acc[1:, :] * inv], axis=0)
        else:
            feat = acc
        if c_pad > n_ch:
            feat = jnp.concatenate(
                [feat, jnp.zeros((c_pad - n_ch, feat.shape[1]), jnp.float32)], axis=0)
        # feat^T @ W^T -> (TM, Cout): output is stored directly in the module layout,
        # no wrapper-side transpose / extra HBM pass.
        out = lax.dot_general(feat, w_ref[...], (((0,), (0,)), ((), ())),
                              preferred_element_type=jnp.float32)   # (TM, Cout)
        out_ref[0] = (out + b_ref[...]).astype(out_ref.dtype)


def _select_tiles(n, m, n_ch, c_out, c_pad, budget_bytes=20 * 1024 * 1024):
    """n-aware tile selection under an explicit VMEM budget."""
    # Context chunk: single chunk when small, else 512 (lane-aligned -> legal BlockSpec).
    if n <= 512:
        nchunk = _round_up(max(n, 1), 8)
        n_pad = nchunk
    else:
        nchunk = 512
        n_pad = _round_up(n, nchunk)

    m_pad = _round_up(max(m, 1), 128)

    def est(tm):
        f = 4
        tmp = 3 * nchunk * tm * f                           # d / gamma*d / exp temporaries
        x_buf = 2 * nchunk * 128 * f                        # (NC,1) block is lane-padded
        y_buf = 2 * _round_up(n_ch, 8) * nchunk * f
        t_buf = 2 * 8 * tm * f
        o_buf = 2 * tm * _round_up(c_out, 128) * f
        w_buf = 2 * c_pad * _round_up(c_out, 128) * f
        b_buf = 2 * 8 * _round_up(c_out, 128) * f
        acc = _round_up(n_ch, 8) * tm * f
        return tmp + x_buf + y_buf + t_buf + o_buf + w_buf + b_buf + acc

    tm = 128
    for cand in (1024, 512, 256, 128):      # cap at 1024 (v7x has half the VMEM of v6e)
        if m_pad % cand == 0 and est(cand) <= budget_bytes:
            tm = cand
            break
    return nchunk, n_pad, tm, m_pad, est(tm)


def conv_deep_set(x, y, t, sigma, w_g, b_g, *, use_density=True, exp_bf16=False):
    """ConvDeepSet forward.

    x: (B, n, 1) or (B, n)        context inputs
    y: (B, n, Ci) or (B, n)       context outputs
    t: (B, m, 1) or (B, m)        target inputs
    sigma: (C,)                   log length-scales, C = Ci + 1 if use_density else Ci
    w_g: (Cout, C), b_g: (Cout,)  pointwise Linear (PyTorch layout)
    Returns (B, m, Cout).
    """
    if x.ndim == 2:
        x = x[..., None]
    if y.ndim == 2:
        y = y[..., None]
    if t.ndim == 2:
        t = t[..., None]
    x = x.astype(jnp.float32)
    y = y.astype(jnp.float32)
    t = t.astype(jnp.float32)

    B, n, _ = x.shape
    m = t.shape[1]
    ci = y.shape[2]
    n_ch = ci + 1 if use_density else ci
    c_out = w_g.shape[0]
    assert w_g.shape == (c_out, n_ch)
    assert sigma.shape == (n_ch,)

    # Fold length-scale transform: exp(-0.5*d/exp(sigma)^2) == exp(d * gamma).
    gamma = (-0.5 * jnp.exp(-2.0 * sigma)).astype(jnp.float32)          # (n_ch,)

    # Linear weight transposed and K zero-padded to a sublane multiple.
    c_pad = _round_up(n_ch, 8)
    w_t = jnp.zeros((c_pad, c_out), jnp.float32).at[:n_ch, :].set(
        jnp.transpose(w_g.astype(jnp.float32)))
    b_row = b_g.astype(jnp.float32).reshape(1, c_out)

    nchunk, n_pad, tm, m_pad, est = _select_tiles(n, m, n_ch, c_out, c_pad)
    # Give the two parallel grid axes at least 2 steps (megacore / v7x dual-TC).
    while B * (m_pad // tm) < 2 and tm > 128:
        tm //= 2

    # [density-ones ; y^T]: contexts lane-dense; zero-padded contexts (incl. the ones
    # row) contribute exactly 0 to every channel, so n-padding is semantics-free.
    y_t = jnp.transpose(y, (0, 2, 1))                                   # (B, Ci, n)
    if use_density:
        y_aug = jnp.concatenate([jnp.ones((B, 1, n), jnp.float32), y_t], axis=1)
    else:
        y_aug = y_t
    if n_pad > n:
        y_aug = jnp.pad(y_aug, ((0, 0), (0, 0), (0, n_pad - n)))
        x = jnp.pad(x, ((0, 0), (0, n_pad - n), (0, 0)))
    if m_pad > m:
        t = jnp.pad(t, ((0, 0), (0, m_pad - m), (0, 0)))
    t_row = jnp.reshape(t, (B, 1, m_pad))    # pure relabel: targets on lanes

    grid = (B, m_pad // tm, n_pad // nchunk)
    vmem_limit = int(min(48 * 1024 * 1024, max(32 * 1024 * 1024, 2 * est)))

    kernel = functools.partial(_convdeepset_kernel, n_ch=n_ch, c_pad=c_pad,
                               use_density=use_density, exp_bf16=exp_bf16)

    out = pl.pallas_call(
        kernel,
        grid=grid,
        in_specs=[
            # per-channel gamma: scalars in SMEM
            pl.BlockSpec(memory_space=pltpu.MemorySpace.SMEM),
            pl.BlockSpec((1, nchunk, 1), lambda b, j, k: (b, k, 0)),
            pl.BlockSpec((1, n_ch, nchunk), lambda b, j, k: (b, 0, k)),
            pl.BlockSpec((1, 1, tm), lambda b, j, k: (b, 0, j)),
            pl.BlockSpec((c_pad, c_out), lambda b, j, k: (0, 0)),
            pl.BlockSpec((1, c_out), lambda b, j, k: (0, 0)),
        ],
        out_specs=pl.BlockSpec((1, tm, c_out), lambda b, j, k: (b, j, 0)),
        out_shape=jax.ShapeDtypeStruct((B, m_pad, c_out), jnp.float32),
        scratch_shapes=[pltpu.VMEM((n_ch, tm), jnp.float32)],
        compiler_params=pltpu.CompilerParams(
            dimension_semantics=("parallel", "parallel", "arbitrary"),
            vmem_limit_bytes=vmem_limit),
    )(gamma, x, y_aug, t_row, w_t, b_row)

    if m_pad > m:
        out = out[:, :m, :]
    return out


def _ref_conv_deep_set(x, y, t, sigma, w_g, b_g, use_density=True):
    """Pure-JAX reference mirroring the PyTorch ConvDeepSet.forward."""
    if x.ndim == 2:
        x = x[..., None]
    if y.ndim == 2:
        y = y[..., None]
    if t.ndim == 2:
        t = t[..., None]
    scales = jnp.exp(sigma)
    dists = (x - jnp.transpose(t, (0, 2, 1))) ** 2                      # (B, n, m)
    wt = jnp.exp(-0.5 * dists[..., None] / scales[None, None, None, :] ** 2)
    if use_density:
        density = jnp.ones(y.shape[:2] + (1,), y.dtype)
        y_cat = jnp.concatenate([density, y], axis=2)
    else:
        y_cat = y
    y_out = (y_cat[:, :, None, :] * wt).sum(axis=1)                     # (B, m, C)
    if use_density:
        dens, conv = y_out[..., :1], y_out[..., 1:]
        y_out = jnp.concatenate([dens, conv / (dens + 1e-8)], axis=-1)
    out = jnp.einsum("bmc,oc->bmo", y_out, w_g,
                     precision=jax.lax.Precision.HIGHEST) + b_g[None, None, :]
    return out


if __name__ == "__main__":
    # Small shapes: batch=2, n=8 context points, m=16 target points,
    # in_channels=4 (+1 density channel), out_channels=32.
    B, n_ctx, m_tgt = 2, 8, 16
    in_channels = 4
    out_channels = 32
    use_density = True
    n_ch = in_channels + 1 if use_density else in_channels

    key = jax.random.PRNGKey(0)
    kx, ky, kw = jax.random.split(key, 3)

    x = jax.random.uniform(kx, (B, n_ctx, 1), jnp.float32, minval=-2.0, maxval=2.0)
    y = jax.random.normal(ky, (B, n_ctx, in_channels), jnp.float32)
    t = jnp.tile(jnp.linspace(-2.0, 2.0, m_tgt, dtype=jnp.float32)[None, :, None],
                 (B, 1, 1))

    # sigma = log(length_scale) per channel (slightly varied so per-channel scales matter).
    init_length_scale = 0.8
    sigma = jnp.log(init_length_scale) + 0.05 * jnp.arange(n_ch, dtype=jnp.float32)

    # Xavier-normal (gain=1) Linear weight, zero bias (matches init_sequential_weights).
    std = float(np.sqrt(2.0 / (n_ch + out_channels)))
    w_g = std * jax.random.normal(kw, (out_channels, n_ch), jnp.float32)
    b_g = jnp.zeros((out_channels,), jnp.float32)

    # exp_bf16 left False here so the f32 reference tolerance holds; enable on v6e/v7x
    # for ~2x on the EUP-bound exp loop after re-validating tolerances.
    out = conv_deep_set(x, y, t, sigma, w_g, b_g, use_density=use_density)
    out = jax.block_until_ready(out)

    ref = jax.block_until_ready(
        _ref_conv_deep_set(x, y, t, sigma, w_g, b_g, use_density=use_density))
    np.testing.assert_allclose(np.asarray(out), np.asarray(ref),
                               rtol=1e-4, atol=1e-5)
    assert out.shape == (B, m_tgt, out_channels)

    print("KERNEL_OK")
</pallas_src>

<mosaic_0001>
module attributes {stable_mosaic.version = 11 : i64} {
  func.func @_convdeepset_kernel(%arg0: i32, %arg1: i32, %arg2: i32, %arg3: memref<5xf32, #tpu.memory_space<smem>>, %arg4: memref<1x8x1xf32, #tpu.memory_space<vmem>>, %arg5: memref<1x5x8xf32, #tpu.memory_space<vmem>>, %arg6: memref<1x1x128xf32, #tpu.memory_space<vmem>>, %arg7: memref<8x32xf32, #tpu.memory_space<vmem>>, %arg8: memref<1x32xf32, #tpu.memory_space<vmem>>, %arg9: memref<1x128x32xf32, #tpu.memory_space<vmem>>, %arg10: memref<5x128xf32, #tpu.memory_space<vmem>>) attributes {dimension_semantics = [#tpu.dimension_semantics<parallel>, #tpu.dimension_semantics<parallel>, #tpu.dimension_semantics<arbitrary>], iteration_bounds = array<i64: 2, 1, 1>, scalar_prefetch = 0 : i64, scratch_operands = 1 : i64, tpu.core_type = #tpu.core_type<tc>, window_params = [{transform_indices = @transform_0, window_bounds = array<i64: 5>}, {transform_indices = @transform_1, window_bounds = array<i64: 1, 8, 1>}, {transform_indices = @transform_2, window_bounds = array<i64: 1, 5, 8>}, {transform_indices = @transform_3, window_bounds = array<i64: 1, 1, 128>}, {pipeline_mode = #tpu.pipeline_mode<synchronous>, transform_indices = @transform_4, window_bounds = array<i64: 8, 32>}, {pipeline_mode = #tpu.pipeline_mode<synchronous>, transform_indices = @transform_5, window_bounds = array<i64: 1, 32>}, {transform_indices = @transform_6, window_bounds = array<i64: 1, 128, 32>}]} {
    %c0_i32 = arith.constant 0 : i32
    %0 = arith.cmpi eq, %arg2, %c0_i32 : i32
    %1 = arith.extui %0 : i1 to i32
    %c0_i32_0 = arith.constant 0 : i32
    %2 = arith.cmpi ne, %1, %c0_i32_0 : i32
    scf.if %2 {
      %cst_20 = arith.constant 0.000000e+00 : f32
      %50 = vector.broadcast %cst_20 : f32 to vector<5x128xf32>
      %c0_21 = arith.constant 0 : index
      %c0_22 = arith.constant 0 : index
      %51 = vector.load %arg10[%c0_21, %c0_22] : memref<5x128xf32, #tpu.memory_space<vmem>>, vector<5x128xf32>
      tpu.vector_store %arg10[%c0_21, %c0_22], %50 {strides = array<i32>} : memref<5x128xf32, #tpu.memory_space<vmem>>, vector<5x128xf32>,
    } else {
    }
    %c0 = arith.constant 0 : index
    %c0_1 = arith.constant 0 : index
    %c0_2 = arith.constant 0 : index
    %3 = vector.load %arg4[%c0, %c0_1, %c0_2] : memref<1x8x1xf32, #tpu.memory_space<vmem>>, vector<1x8x1xf32>
    %4 = vector.shape_cast %3 : vector<1x8x1xf32> to vector<8x1xf32>
    %c0_3 = arith.constant 0 : index
    %c0_4 = arith.constant 0 : index
    %c0_5 = arith.constant 0 : index
    %5 = vector.load %arg6[%c0_3, %c0_4, %c0_5] : memref<1x1x128xf32, #tpu.memory_space<vmem>>, vector<1x1x128xf32>
    %6 = vector.shape_cast %5 : vector<1x1x128xf32> to vector<1x128xf32>
    %7 = vector.broadcast %4 : vector<8x1xf32> to vector<8x128xf32>
    %8 = vector.broadcast %6 : vector<1x128xf32> to vector<8x128xf32>
    %9 = arith.subf %7, %8 : vector<8x128xf32>
    %10 = arith.mulf %9, %9 : vector<8x128xf32>
    %c0_6 = arith.constant 0 : index
    %c0_7 = arith.constant 0 : index
    %c0_8 = arith.constant 0 : index
    %11 = vector.load %arg5[%c0_6, %c0_7, %c0_8] : memref<1x5x8xf32, #tpu.memory_space<vmem>>, vector<1x5x8xf32>
    %12 = vector.shape_cast %11 : vector<1x5x8xf32> to vector<5x8xf32>
    %c0_9 = arith.constant 0 : index
    %13 = memref.load %arg3[%c0_9] : memref<5xf32, #tpu.memory_space<smem>>
    %14 = vector.broadcast %13 : f32 to vector<8x128xf32>
    %15 = arith.mulf %10, %14 : vector<8x128xf32>
    %16 = math.exp %15 : vector<8x128xf32>
    %17 = vector.extract_strided_slice %12 {offsets = [0, 0], sizes = [1, 8], strides = [1, 1]} : vector<5x8xf32> to vector<1x8xf32>
    %cst = arith.constant dense<0.000000e+00> : vector<1x128xf32>
    %18 = tpu.matmul %17, %16, %cst {dimension_numbers = #tpu.dot_dimension_numbers<[1], [0], [0], [1], [0, 0, 1, 1], [], []>} : vector<1x8xf32>, vector<8x128xf32>, vector<1x128xf32> -> vector<1x128xf32>
    %c1 = arith.constant 1 : index
    %19 = memref.load %arg3[%c1] : memref<5xf32, #tpu.memory_space<smem>>
    %20 = vector.broadcast %19 : f32 to vector<8x128xf32>
    %21 = arith.mulf %10, %20 : vector<8x128xf32>
    %22 = math.exp %21 : vector<8x128xf32>
    %23 = vector.extract_strided_slice %12 {offsets = [1, 0], sizes = [1, 8], strides = [1, 1]} : vector<5x8xf32> to vector<1x8xf32>
    %cst_10 = arith.constant dense<0.000000e+00> : vector<1x128xf32>
    %24 = tpu.matmul %23, %22, %cst_10 {dimension_numbers = #tpu.dot_dimension_numbers<[1], [0], [0], [1], [0, 0, 1, 1], [], []>} : vector<1x8xf32>, vector<8x128xf32>, vector<1x128xf32> -> vector<1x128xf32>
    %c2 = arith.constant 2 : index
    %25 = memref.load %arg3[%c2] : memref<5xf32, #tpu.memory_space<smem>>
    %26 = vector.broadcast %25 : f32 to vector<8x128xf32>
    %27 = arith.mulf %10, %26 : vector<8x128xf32>
    %28 = math.exp %27 : vector<8x128xf32>
    %29 = vector.extract_strided_slice %12 {offsets = [2, 0], sizes = [1, 8], strides = [1, 1]} : vector<5x8xf32> to vector<1x8xf32>
    %cst_11 = arith.constant dense<0.000000e+00> : vector<1x128xf32>
    %30 = tpu.matmul %29, %28, %cst_11 {dimension_numbers = #tpu.dot_dimension_numbers<[1], [0], [0], [1], [0, 0, 1, 1], [], []>} : vector<1x8xf32>, vector<8x128xf32>, vector<1x128xf32> -> vector<1x128xf32>
    %c3 = arith.constant 3 : index
    %31 = memref.load %arg3[%c3] : memref<5xf32, #tpu.memory_space<smem>>
    %32 = vector.broadcast %31 : f32 to vector<8x128xf32>
    %33 = arith.mulf %10, %32 : vector<8x128xf32>
    %34 = math.exp %33 : vector<8x128xf32>
    %35 = vector.extract_strided_slice %12 {offsets = [3, 0], sizes = [1, 8], strides = [1, 1]} : vector<5x8xf32> to vector<1x8xf32>
    %cst_12 = arith.constant dense<0.000000e+00> : vector<1x128xf32>
    %36 = tpu.matmul %35, %34, %cst_12 {dimension_numbers = #tpu.dot_dimension_numbers<[1], [0], [0], [1], [0, 0, 1, 1], [], []>} : vector<1x8xf32>, vector<8x128xf32>, vector<1x128xf32> -> vector<1x128xf32>
    %c4 = arith.constant 4 : index
    %37 = memref.load %arg3[%c4] : memref<5xf32, #tpu.memory_space<smem>>
    %38 = vector.broadcast %37 : f32 to vector<8x128xf32>
    %39 = arith.mulf %10, %38 : vector<8x128xf32>
    %40 = math.exp %39 : vector<8x128xf32>
    %41 = vector.extract_strided_slice %12 {offsets = [4, 0], sizes = [1, 8], strides = [1, 1]} : vector<5x8xf32> to vector<1x8xf32>
    %cst_13 = arith.constant dense<0.000000e+00> : vector<1x128xf32>
    %42 = tpu.matmul %41, %40, %cst_13 {dimension_numbers = #tpu.dot_dimension_numbers<[1], [0], [0], [1], [0, 0, 1, 1], [], []>} : vector<1x8xf32>, vector<8x128xf32>, vector<1x128xf32> -> vector<1x128xf32>
    %c0_14 = arith.constant 0 : index
    %c0_15 = arith.constant 0 : index
    %43 = vector.load %arg10[%c0_14, %c0_15] : memref<5x128xf32, #tpu.memory_space<vmem>>, vector<5x128xf32>
    %44 = tpu.concatenate %18, %24, %30, %36, %42 in 0 : vector<1x128xf32>, vector<1x128xf32>, vector<1x128xf32>, vector<1x128xf32>, vector<1x128xf32> -> vector<5x128xf32>
    %45 = arith.addf %43, %44 : vector<5x128xf32>
    %c0_16 = arith.constant 0 : index
    %c0_17 = arith.constant 0 : index
    %46 = vector.load %arg10[%c0_16, %c0_17] : memref<5x128xf32, #tpu.memory_space<vmem>>, vector<5x128xf32>
    tpu.vector_store %arg10[%c0_16, %c0_17], %45 {strides = array<i32>} : memref<5x128xf32, #tpu.memory_space<vmem>>, vector<5x128xf32>,
    %c0_i32_18 = arith.constant 0 : i32
    %47 = arith.cmpi eq, %arg2, %c0_i32_18 : i32
    %48 = arith.extui %47 : i1 to i32
    %c0_i32_19 = arith.constant 0 : i32
    %49 = arith.cmpi ne, %48, %c0_i32_19 : i32
    scf.if %49 {
      %c0_20 = arith.constant 0 : index
      %c0_21 = arith.constant 0 : index
      %50 = vector.load %arg10[%c0_20, %c0_21] : memref<5x128xf32, #tpu.memory_space<vmem>>, vector<5x128xf32>
      %51 = vector.extract_strided_slice %50 {offsets = [0, 0], sizes = [1, 128], strides = [1, 1]} : vector<5x128xf32> to vector<1x128xf32>
      %cst_22 = arith.constant 9.99999993E-9 : f32
      %52 = vector.broadcast %cst_22 : f32 to vector<1x128xf32>
      %53 = arith.addf %51, %52 : vector<1x128xf32>
      %cst_23 = arith.constant 1.000000e+00 : f32
      %54 = vector.broadcast %cst_23 : f32 to vector<1x128xf32>
      %55 = arith.divf %54, %53 : vector<1x128xf32>
      %56 = vector.extract_strided_slice %50 {offsets = [1, 0], sizes = [4, 128], strides = [1, 1]} : vector<5x128xf32> to vector<4x128xf32>
      %57 = vector.broadcast %55 : vector<1x128xf32> to vector<4x128xf32>
      %58 = arith.mulf %56, %57 : vector<4x128xf32>
      %59 = tpu.concatenate %51, %58 in 0 : vector<1x128xf32>, vector<4x128xf32> -> vector<5x128xf32>
      %cst_24 = arith.constant 0.000000e+00 : f32
      %60 = vector.broadcast %cst_24 : f32 to vector<3x128xf32>
      %61 = tpu.concatenate %59, %60 in 0 : vector<5x128xf32>, vector<3x128xf32> -> vector<8x128xf32>
      %c0_25 = arith.constant 0 : index
      %c0_26 = arith.constant 0 : index
      %62 = vector.load %arg7[%c0_25, %c0_26] : memref<8x32xf32, #tpu.memory_space<vmem>>, vector<8x32xf32>
      %cst_27 = arith.constant dense<0.000000e+00> : vector<128x32xf32>
      %63 = tpu.matmul %61, %62, %cst_27 {dimension_numbers = #tpu.dot_dimension_numbers<[0], [0], [1], [1], [0, 1, 1, 1], [], []>} : vector<8x128xf32>, vector<8x32xf32>, vector<128x32xf32> -> vector<128x32xf32>
      %c0_28 = arith.constant 0 : index
      %c0_29 = arith.constant 0 : index
      %64 = vector.load %arg8[%c0_28, %c0_29] : memref<1x32xf32, #tpu.memory_space<vmem>>, vector<1x32xf32>
      %65 = vector.broadcast %64 : vector<1x32xf32> to vector<128x32xf32>
      %66 = arith.addf %63, %65 : vector<128x32xf32>
      %c0_30 = arith.constant 0 : index
      %c0_31 = arith.constant 0 : index
      %c0_32 = arith.constant 0 : index
      %67 = vector.load %arg9[%c0_30, %c0_31, %c0_32] : memref<1x128x32xf32, #tpu.memory_space<vmem>>, vector<1x128x32xf32>
      %68 = vector.shape_cast %67 : vector<1x128x32xf32> to vector<128x32xf32>
      %69 = vector.shape_cast %66 : vector<128x32xf32> to vector<1x128x32xf32>
      tpu.vector_store %arg9[%c0_30, %c0_31, %c0_32], %69 {strides = array<i32>} : memref<1x128x32xf32, #tpu.memory_space<vmem>>, vector<1x128x32xf32>,
    } else {
    }
    return
  }
  func.func @transform_0(%arg0: i32, %arg1: i32, %arg2: i32) -> i32 {
    %c0_i32 = arith.constant 0 : i32
    %c0_i32_0 = arith.constant 0 : i32
    return %c0_i32 : i32
  }
  func.func @transform_1(%arg0: i32, %arg1: i32, %arg2: i32) -> (i32, i32, i32) {
    %c0_i32 = arith.constant 0 : i32
    %c0_i32_0 = arith.constant 0 : i32
    return %arg0, %arg2, %c0_i32 : i32, i32, i32
  }
  func.func @transform_2(%arg0: i32, %arg1: i32, %arg2: i32) -> (i32, i32, i32) {
    %c0_i32 = arith.constant 0 : i32
    %c0_i32_0 = arith.constant 0 : i32
    return %arg0, %c0_i32, %arg2 : i32, i32, i32
  }
  func.func @transform_3(%arg0: i32, %arg1: i32, %arg2: i32) -> (i32, i32, i32) {
    %c0_i32 = arith.constant 0 : i32
    %c0_i32_0 = arith.constant 0 : i32
    return %arg0, %c0_i32, %arg1 : i32, i32, i32
  }
  func.func @transform_4(%arg0: i32, %arg1: i32, %arg2: i32) -> (i32, i32) {
    %c0_i32 = arith.constant 0 : i32
    %c0_i32_0 = arith.constant 0 : i32
    %c0_i32_1 = arith.constant 0 : i32
    return %c0_i32, %c0_i32_0 : i32, i32
  }
  func.func @transform_5(%arg0: i32, %arg1: i32, %arg2: i32) -> (i32, i32) {
    %c0_i32 = arith.constant 0 : i32
    %c0_i32_0 = arith.constant 0 : i32
    %c0_i32_1 = arith.constant 0 : i32
    return %c0_i32, %c0_i32_0 : i32, i32
  }
  func.func @transform_6(%arg0: i32, %arg1: i32, %arg2: i32) -> (i32, i32, i32) {
    %c0_i32 = arith.constant 0 : i32
    %c0_i32_0 = arith.constant 0 : i32
    return %arg0, %arg1, %c0_i32 : i32, i32, i32
  }
}

</mosaic_0001>

<bundles_post_ra>
// kernel: tpu_custom_call.1
= control target key start
LH: loop header
LB: loop body
LE: loop exit
PB: predicated region body
PF: predicated region fallthrough
CT: control target
= control target key end

     0   :  { %11 = vsyncpa [#allocation4], 0  ;;  %s1031_s21 = smov 0   ;;  %s1033_s22 = smov 0   ;;  %s1142_s0 = inlined_call_operand.vmem [shape: f32[5], index: 0, kind: input, shape index: {}]   ;;  %s1143_s1 = inlined_call_operand.vmem [shape: f32[2,8,1], index: 1, kind: input, shape index: {}]   ;;  %s1144_s2 = inlined_call_operand.vmem [shape: f32[2,5,8], index: 2, kind: input, shape index: {}]   ;;  %s1145_s3 = inlined_call_operand.vmem [shape: f32[2,1,128], index: 3, kind: input, shape index: {}]   ;;  %s1146_s4 = inlined_call_operand.vmem [shape: f32[8,32], index: 4, kind: input, shape index: {}]   ;;  %s1147_s5 = inlined_call_operand.vmem [shape: f32[1,32], index: 5, kind: input, shape index: {}]   ;;  %s1148_s6 = inlined_call_operand.vmem [shape: f32[2,128,32], index: 6, kind: output, shape index: {}]  }
   0x1   :  { %s1035_s23 = smov 0  }
   0x2 LB: > { %s857_s24 = sadd.s32 4294967295, %s991_s23   ;;  %s36_s25 = sadd.s32 1, %s987_s22  ;;  %s991_s23 = sphi %s1035_s23, %s17_s23   ;;  %s987_s22 = sphi %s1033_s22, %s1150_s22   ;;  %s983_s21 = sphi %s1031_s21, %s1149_s21  }
   0x3   : > { %p38_p0 = scmp.ge.s32.totalorder %s36_s25, 2  ;;  %p859_p1 = scmp.ge.s32.totalorder %s991_s23, 1 }
   0x4   : > { %p216_p2 = scmp.lt.s32.totalorder %s991_s23, 3  ;;  %p906_p4 = scmp.eq.s32.totalorder %s857_s24, 0 }
   0x5   : > { %s1152_s25 = smov (%p38_p0, %s36_s25), 0  ;;  %s228_s28 = sshll.u32 %s1142_s0, 4  ;;  %s229_s28 = int_to_ptr.vmem [resolvable:$true] %s228_s28 }
   0x6   : > { %p217_p3 = pnand %p859_p1, %p216_p2  ;;  %s993_s29 = smov [#allocation3]  }
   0x8   : > { %p902_p5 = pneg %p217_p3  ;;  %276 = sbr.rel (%p217_p3) target bundleno = 769 (0x301), region = 44 }
   0xa   : > { %p903_p6 = pnand %p906_p4, %p902_p5 }
   0xc   : > { %905 = dma.vmem_to_smem (!%p903_p6), %s229_s28, 16, %s993_s29, [#allocation4]  }
   0xd   : > { %978 = dma.done.wait (%p906_p4), [#allocation4], 16  }
   0xe   : > { %980 = vsyncadd (%p906_p4), [#allocation4], 4294967280 }
   0xf   : > { %283 = sfence }
  0x10   : > { %p327_p7 = scmp.lt.s32.totalorder %s983_s21, 1  ;;  %v994_v0 = vmov 0   ;;  %s375_s13 = sld [smem:[#allocation3]]  ;;  %vm380_vm0 = vcmask 64512   ;;  %v995_v31 = vmov 0.0   ;;  %vm529_vm1 = vcmask 1040384  }
  0x11   : > { %935 = vset.pattern.permute.xlu0 %v994_v0  ;;  %s869_s14 = sld [smem:[#allocation3 + $0x1]]  ;;  %361 = vst [vmem:[#allocation2] sm:$0x1f] %v995_v31  ;;  %vm531_vm2 = vcmask 1041408   ;;  %vm533_vm3 = vcmask 1042432   ;;  %vm535_vm4 = vcmask 1043456  }
  0x12   : > { %s1154_s21 = smov (!%p327_p7, %s983_s21), 1  ;;  %s871_s15 = sld [smem:[#allocation3 + $0x2]]  ;;  %v564_v47 = vld [vmem:[%s1146_s4] sm:$0xff]  ;;  %vm562_vm9 = vcmask 1044480   ;;  %vm714_vm10 = vcmask 261120  }
  0x13   : > { %s864_s30 = sshll.u32 %s1154_s21, 3  ;;  %s346_s12 = scalar_lea.vmem %s1145_s3, %s1154_s21  ;;  %664 = vmatpush.msra.mxu1 %v564_v47  ;;  %896 = vmatpush.msra.mxu2 %v564_v47 }
  0x14   : > { %s333_s9 = scalar_lea.vmem %s1143_s1, %s864_s30  ;;  %v936_v2 = vld [vmem:[%s346_s12] ss:$0 sm:$0xff]  ;;  %s873_s16 = sld [smem:[#allocation3 + $0x3]]  ;;  %897 = vmatpush.msra.mxu3 %v564_v47 }
  0x15   : > { %v362_v1 = vld [vmem:[%s333_s9] sm:$0xff]  ;;  %s875_s17 = sld [smem:[#allocation3 + $0x4]]  ;;  %s340_s20 = scalar_lea.vmem %s1144_s2, %s864_s30 }
  0x16   : > { %366 = vperm.xlu0 %935, %v362_v1   ;;  %v376_v5 = vstv %s375_s13  ;;  %v374_v17 = vld [vmem:[%s340_s20] sm:$0x1f]  ;;  %s895_s27 = sshll.u32 %s1154_s21, 7 }
  0x17   : > { %v405_v7 = vstv %s869_s14  ;;  %v409_v24 = vrot.slane %v374_v17, 1  ;;  %v437_v27 = vrot.slane %v374_v17, 2  ;;  %v465_v29 = vrot.slane %v374_v17, 3  ;;  %s1099_s8 = scalar_lea.vmem %s1148_s6, %s895_s27 }
  0x18   : > { %v433_v8 = vstv %s871_s15  ;;  %v493_v30 = vrot.slane %v374_v17, 4  ;;  %v516_v42 = vld [vmem:[#allocation2] sm:$0x1f] }
  0x1a   : > { %v461_v14 = vstv %s873_s16 }
  0x1b   : > { %v489_v21 = vstv %s875_s17 }
  0x88   : > { %v367_v3 = vpop.permute.xlu0 %366 }
  0x89   : > { %v372_v4 = vsub.f32 %v367_v3, %v936_v2 }
  0x8b   : > { %v373_v6 = vmul.f32 %v372_v4, %v372_v4 }
  0x8d   : > { %v377_v9 = vmul.f32 %v376_v5, %v373_v6  ;;  %v406_v10 = vmul.f32 %v405_v7, %v373_v6  ;;  %v434_v11 = vmul.f32 %v433_v8, %v373_v6  ;;  %v462_v16 = vmul.f32 %v461_v14, %v373_v6 }
  0x8e   : > { %v490_v23 = vmul.f32 %v489_v21, %v373_v6 }
  0x8f   : > { %v378_v12 = vmul.f32 1.442695, %v377_v9  ;;  %v407_v13 = vmul.f32 1.442695, %v406_v10  ;;  %v435_v15 = vmul.f32 1.442695, %v434_v11 }
  0x90   : > { %v463_v19 = vmul.f32 1.442695, %v462_v16  ;;  %v491_v25 = vmul.f32 1.442695, %v490_v23  ;;  %v937_v16 = vld [vmem:[%s1147_s5] ss:$0 sm:$0xff] }
  0x91   : > { %938 = vpow2.f32 %v378_v12 }
  0x92   : > { %940 = vpow2.f32 %v407_v13 }
  0x93   : > { %942 = vpow2.f32 %v435_v15 }
  0x94   : > { %944 = vpow2.f32 %v463_v19 }
  0x95   : > { %946 = vpow2.f32 %v491_v25 }
  0x97   : > { %v939_v18 = vpop.eup %938 }
  0x98   : > { %v941_v20 = vpop.eup %940  ;;  %399 = vmatpush.msra.mxu0 %v939_v18 }
  0x99   : > { %868 = vmatmul.msk.f32.vlgmr.msra.gmra.mxu0 %vm380_vm0, %v374_v17  ;;  %v943_v22 = vpop.eup %942 }
  0x9a   : > { %427 = vmatpush.msrb.mxu0 %v941_v20  ;;  %v945_v26 = vpop.eup %944 }
  0x9b   : > { %v947_v28 = vpop.eup %946 }
  0x9c   : > { %455 = vmatpush.msra.mxu0 %v943_v22 }
  0xa1   : > { %870 = vmatmul.msk.f32.vlgmr.msrb.gmra.mxu0 %vm380_vm0, %v409_v24 }
  0xa2   : > { %483 = vmatpush.msrb.mxu0 %v945_v26 }
  0xa9   : > { %872 = vmatmul.msk.f32.vlgmr.msra.gmra.mxu0 %vm380_vm0, %v437_v27 }
  0xaa   : > { %511 = vmatpush.msra.mxu0 %v947_v28 }
  0xb1   : > { %874 = vmatmul.msk.f32.vlgmr.msrb.gmra.mxu0 %vm380_vm0, %v465_v29 }
  0xb9   : > { %876 = vmatmul.msk.f32.vlgmr.msra.gmra.mxu0 %vm380_vm0, %v493_v30 }
 0x116   : > { %v401_v32 = vpop.f32.mrf.mxu0 }
 0x11e   : > { %v429_v33 = vpop.f32.mrf.mxu0 }
 0x11f   : > { %v518_v36 = vrot.slane %v429_v33, 7 }
 0x121   : > { %v530_v39 = vsel %vm529_vm1, %v401_v32, %v518_v36 }
 0x126   : > { %v457_v34 = vpop.f32.mrf.mxu0 }
 0x127   : > { %v521_v37 = vrot.slane %v457_v34, 6 }
 0x129   : > { %v532_v41 = vsel %vm531_vm2, %v530_v39, %v521_v37 }
 0x12e   : > { %v485_v35 = vpop.f32.mrf.mxu0 }
 0x12f   : > { %v524_v38 = vrot.slane %v485_v35, 5 }
 0x131   : > { %v534_v44 = vsel %vm533_vm3, %v532_v41, %v524_v38 }
 0x136   : > { %v513_v40 = vpop.f32.mrf.mxu0 }
 0x137   : > { %v527_v43 = vrot.slane %v513_v40, 4 }
 0x139   : > { %v536_v45 = vsel %vm535_vm4, %v534_v44, %v527_v43 }
 0x13a   : > { %v537_v46 = vadd.f32 %v536_v45, %v516_v42 }
 0x13c   : > { %538 = vst [vmem:[#allocation2] sm:$0x1f] %v537_v46 }
 0x143   : > { %v542_v48 = vld [vmem:[#allocation2] sm:$0x1f] }
 0x144   : > { %v543_v49 = vadd.f32 1e-08, %v542_v48 }
 0x146   : > { %948 = vrcp.f32 %v543_v49  ;;  %v555_v53 = vand.u32 2147483648, %v543_v49  ;;  %v553_v55 = vand.u32 2147483647, %v543_v49  ;;  %vm549_vm6 = vweird.f32 %v543_v49 }
 0x148   : > { %v556_v57 = vor.u32 1.1754944e-38, %v555_v53  ;;  %vm554_vm8 = vcmp.eq.f32.partialorder %v553_v55, 8.507059e+37 }
 0x14c   : > { %v949_v50 = vpop.eup %948 }
 0x14d   : > { %v545_v51 = vmul.f32 %v949_v50, %v543_v49  ;;  %vm550_vm5 = vweird.f32 %v949_v50 }
 0x14e   : > { %vm551_vm7 = vmor %vm549_vm6, %vm550_vm5 }
 0x14f   : > { %v546_v52 = vsub.f32 1.0, %v545_v51 }
 0x151   : > { %v547_v54 = vmul.f32 %v949_v50, %v546_v52 }
 0x153   : > { %v548_v56 = vadd.f32 %v949_v50, %v547_v54 }
 0x155   : > { %v552_v58 = vsel %vm551_vm7, %v949_v50, %v548_v56 }
 0x156   : > { %v557_v59 = vsel %vm554_vm8, %v556_v57, %v552_v58 }
 0x157   : > { %v559_v60 = vperm.slane %v557_v59, 0 }
 0x159   : > { %v560_v61 = vmul.f32 %v559_v60, %v542_v48 }
 0x15b   : > { %v561_v62 = vsel %vm529_vm1, %v542_v48, %v560_v61 }
 0x15c   : > { %v563_v63 = vsel %vm562_vm9, %v561_v62, 0.0 }
 0x15d   : > { %569 = vxpose.xlu0.b32.start.end [1/1] (short) %v563_v63, 128 }
 0x201   : > { %v585_v0 = vpop.trf.xlu0 }
 0x202   : > { %877 = vmatmul.msk.f32.vlgmr.msra.gmra.mxu1 %vm380_vm0, %v585_v0 }
 0x209   : > { %v586_v1 = vpop.trf.xlu0 }
 0x20a   : > { %878 = vmatmul.msk.f32.gmra.mxu1 %vm380_vm0, %v586_v1 }
 0x211   : > { %v587_v2 = vpop.trf.xlu0 }
 0x212   : > { %879 = vmatmul.msk.f32.gmra.mxu1 %vm380_vm0, %v587_v2 }
 0x219   : > { %v588_v3 = vpop.trf.xlu0 }
 0x21a   : > { %880 = vmatmul.msk.f32.gmra.mxu1 %vm380_vm0, %v588_v3 }
 0x221   : > { %v589_v4 = vpop.trf.xlu0 }
 0x222   : > { %881 = vmatmul.msk.f32.gmra.mxu1 %vm380_vm0, %v589_v4 }
 0x229   : > { %v590_v5 = vpop.trf.xlu0 }
 0x22a   : > { %882 = vmatmul.msk.f32.vlgmr.msra.gmra.mxu2 %vm380_vm0, %v590_v5 }
 0x231   : > { %v591_v6 = vpop.trf.xlu0 }
 0x232   : > { %883 = vmatmul.msk.f32.gmra.mxu2 %vm380_vm0, %v591_v6 }
 0x239   : > { %v592_v7 = vpop.trf.xlu0 }
 0x23a   : > { %884 = vmatmul.msk.f32.gmra.mxu2 %vm380_vm0, %v592_v7 }
 0x241   : > { %v593_v8 = vpop.trf.xlu0 }
 0x242   : > { %885 = vmatmul.msk.f32.gmra.mxu2 %vm380_vm0, %v593_v8 }
 0x249   : > { %v594_v9 = vpop.trf.xlu0 }
 0x24a   : > { %886 = vmatmul.msk.f32.gmra.mxu2 %vm380_vm0, %v594_v9 }
 0x251   : > { %v595_v10 = vpop.trf.xlu0 }
 0x252   : > { %887 = vmatmul.msk.f32.vlgmr.msra.gmra.mxu3 %vm380_vm0, %v595_v10 }
 0x259   : > { %v596_v11 = vpop.trf.xlu0 }
 0x25a   : > { %888 = vmatmul.msk.f32.gmra.mxu3 %vm380_vm0, %v596_v11 }
 0x261   : > { %v597_v12 = vpop.trf.xlu0 }
 0x262   : > { %889 = vmatmul.msk.f32.gmra.mxu3 %vm380_vm0, %v597_v12 }
 0x269   : > { %v598_v13 = vpop.trf.xlu0 }
 0x26a   : > { %890 = vmatmul.msk.f32.gmra.mxu3 %vm380_vm0, %v598_v13 }
 0x271   : > { %v599_v14 = vpop.trf.xlu0 }
 0x272   : > { %891 = vmatmul.msk.f32.gmra.mxu3 %vm380_vm0, %v599_v14 }
 0x279   : > { %v600_v15 = vpop.trf.xlu0 }
 0x27a   : > { %892 = vmatmul.msk.f32.gmra.mxu3 %vm380_vm0, %v600_v15 }
 0x27f   : > { %v666_v17 = vpop.f32.mrf.mxu1 }
 0x280   : > { %v667_v18 = vadd.f32 %v937_v16, %v666_v17 }
 0x282   : > { %715 = vst.msk [vmem:[%s1099_s8] sm:$0xff] %vm714_vm10, %v667_v18 }
 0x287   : > { %v669_v19 = vpop.f32.mrf.mxu1 }
 0x288   : > { %v670_v20 = vadd.f32 %v937_v16, %v669_v19 }
 0x28a   : > { %716 = vst.msk [vmem:[%s1099_s8 + $0x8] sm:$0xff] %vm714_vm10, %v670_v20 }
 0x28f   : > { %v672_v21 = vpop.f32.mrf.mxu1 }
 0x290   : > { %v673_v22 = vadd.f32 %v937_v16, %v672_v21 }
 0x292   : > { %717 = vst.msk [vmem:[%s1099_s8 + $0x10] sm:$0xff] %vm714_vm10, %v673_v22 }
 0x297   : > { %v675_v23 = vpop.f32.mrf.mxu1 }
 0x298   : > { %v676_v24 = vadd.f32 %v937_v16, %v675_v23 }
 0x29a   : > { %718 = vst.msk [vmem:[%s1099_s8 + $0x18] sm:$0xff] %vm714_vm10, %v676_v24 }
 0x29f   : > { %v678_v25 = vpop.f32.mrf.mxu1 }
 0x2a0   : > { %v679_v26 = vadd.f32 %v937_v16, %v678_v25 }
 0x2a2   : > { %719 = vst.msk [vmem:[%s1099_s8 + $0x20] sm:$0xff] %vm714_vm10, %v679_v26 }
 0x2ad   : > { %v681_v27 = vpop.f32.mrf.mxu2 }
 0x2ae   : > { %v682_v28 = vadd.f32 %v937_v16, %v681_v27 }
 0x2b0   : > { %720 = vst.msk [vmem:[%s1099_s8 + $0x28] sm:$0xff] %vm714_vm10, %v682_v28 }
 0x2b5   : > { %v684_v29 = vpop.f32.mrf.mxu2 }
 0x2b6   : > { %v685_v30 = vadd.f32 %v937_v16, %v684_v29 }
 0x2b8   : > { %721 = vst.msk [vmem:[%s1099_s8 + $0x30] sm:$0xff] %vm714_vm10, %v685_v30 }
 0x2bd   : > { %v687_v31 = vpop.f32.mrf.mxu2 }
 0x2be   : > { %v688_v32 = vadd.f32 %v937_v16, %v687_v31 }
 0x2c0   : > { %722 = vst.msk [vmem:[%s1099_s8 + $0x38] sm:$0xff] %vm714_vm10, %v688_v32 }
 0x2c5   : > { %v690_v33 = vpop.f32.mrf.mxu2 }
 0x2c6   : > { %v691_v34 = vadd.f32 %v937_v16, %v690_v33 }
 0x2c8   : > { %723 = vst.msk [vmem:[%s1099_s8 + $0x40] sm:$0xff] %vm714_vm10, %v691_v34 }
 0x2cd   : > { %v693_v35 = vpop.f32.mrf.mxu2 }
 0x2ce   : > { %v694_v36 = vadd.f32 %v937_v16, %v693_v35 }
 0x2d0   : > { %724 = vst.msk [vmem:[%s1099_s8 + $0x48] sm:$0xff] %vm714_vm10, %v694_v36 }
 0x2d5   : > { %v696_v37 = vpop.f32.mrf.mxu3 }
 0x2d6   : > { %v697_v38 = vadd.f32 %v937_v16, %v696_v37 }
 0x2d8   : > { %725 = vst.msk [vmem:[%s1099_s8 + $0x50] sm:$0xff] %vm714_vm10, %v697_v38 }
 0x2dd   : > { %v699_v39 = vpop.f32.mrf.mxu3 }
 0x2de   : > { %v700_v40 = vadd.f32 %v937_v16, %v699_v39 }
 0x2e0   : > { %726 = vst.msk [vmem:[%s1099_s8 + $0x58] sm:$0xff] %vm714_vm10, %v700_v40 }
 0x2e5   : > { %v702_v41 = vpop.f32.mrf.mxu3 }
 0x2e6   : > { %v703_v42 = vadd.f32 %v937_v16, %v702_v41 }
 0x2e8   : > { %727 = vst.msk [vmem:[%s1099_s8 + $0x60] sm:$0xff] %vm714_vm10, %v703_v42 }
 0x2ed   : > { %v705_v43 = vpop.f32.mrf.mxu3 }
 0x2ee   : > { %v706_v44 = vadd.f32 %v937_v16, %v705_v43 }
 0x2f0   : > { %728 = vst.msk [vmem:[%s1099_s8 + $0x68] sm:$0xff] %vm714_vm10, %v706_v44 }
 0x2f5   : > { %v708_v45 = vpop.f32.mrf.mxu3 }
 0x2f6   : > { %v709_v46 = vadd.f32 %v937_v16, %v708_v45 }
 0x2f8   : > { %729 = vst.msk [vmem:[%s1099_s8 + $0x70] sm:$0xff] %vm714_vm10, %v709_v46 }
 0x2fd   : > { %v711_v47 = vpop.f32.mrf.mxu3 }
 0x2fe   : > { %v712_v48 = vadd.f32 %v937_v16, %v711_v47 }
 0x300   : > { %730 = vst.msk [vmem:[%s1099_s8 + $0x78] sm:$0xff] %vm714_vm10, %v712_v48 }
 0x301 PF: > { %s17_s23 = sadd.s32 1, %s991_s23   ;;  %s1149_s21 = smov %s987_s22 }
 0x302   : > { %p14_p8 = scmp.ge.s32.totalorder %s17_s23, 4   ;;  %s1150_s22 = smov %s1152_s25 }
 0x304   :  { %16 = sbr.rel (!%p14_p8) target bundleno = 2 (0x2), region = 93 }
 0x309   :  { %761 = vsyncpa [#allocation4], 1 }
 0x30a   :  { %763 = vsyncpa [#allocation4 + $0x1], 1 }

</bundles_post_ra>
